<compile_context>
chip_gen: v5e
topology: v5e:2x2
jax: 0.10.0
libtpu: 0.0.40
codegen_flags: <defaults>
</compile_context>

<pallas_src>
import functools

import jax
import jax.numpy as jnp
from jax.experimental import pallas as pl
from jax.experimental.pallas import tpu as pltpu


_SUBLANE = 16  # bf16-safe sublane multiple (also satisfies f32's 8-row rule)


def _round_up(x, m):
    return ((x + m - 1) // m) * m


def _fused_mlp_kernel(*refs, n_layers):
    """Fused MLP: (Linear -> ReLU) * (n_layers-1) -> Linear -> tanh.

    refs layout: (x_ref, w0_ref, b0_ref, w1_ref, b1_ref, ..., o_ref)
      x_ref:  (M, K0)      input activations (batch tile), f32 or bf16
      wi_ref: (Ki, Ki+1)   weight, pre-transposed vs. PyTorch's (out, in)
      bi_ref: (1, Ki+1)    bias row vector, always f32
      o_ref:  (M, K_last)  output
    Intermediates never leave registers/VMEM; only the final result is stored.
    """
    x_ref = refs[0]
    o_ref = refs[-1]
    wb_refs = refs[1:-1]

    h = x_ref[...]
    for i in range(n_layers):
        w_ref = wb_refs[2 * i]
        b_ref = wb_refs[2 * i + 1]
        # MXU matmul with f32 accumulation; f32 bias keeps intermediates f32
        # even when x / w are bf16.
        y = jnp.dot(h, w_ref[...], preferred_element_type=jnp.float32) + b_ref[...]
        if i < n_layers - 1:
            h = jnp.maximum(y, 0.0)   # ReLU (hidden layers)
        else:
            h = jnp.tanh(y)           # tanh (output layer)
    o_ref[...] = h.astype(o_ref.dtype)


def _pick_batch_tile(m, block_batch, num_cores):
    """Rows per grid step.

    Single full block for small batches on 1-core parts; otherwise a tile that
    is a multiple of 16 sublanes and gives at least `num_cores` grid blocks so
    CORE_PARALLEL sharding (v7x) has work for every TensorCore.
    """
    if m <= block_batch and num_cores <= 1:
        return m
    n_blocks = max(num_cores, pl.cdiv(m, block_batch))
    bm = min(block_batch, _round_up(pl.cdiv(m, n_blocks), _SUBLANE))
    bm = min(bm, _round_up(m, _SUBLANE))
    return max(bm, _SUBLANE)


def _estimate_vmem_bytes(bm, k_in, action_dims, params, state_dtype,
                         single_buffer_params):
    item = jnp.dtype(state_dtype).itemsize
    total = 2 * bm * k_in * item             # double-buffered input tile
    total += 2 * bm * action_dims * item     # double-buffered output tile
    n_param_bufs = 1 if single_buffer_params else 2
    for w, b in params:
        total += n_param_bufs * (w.size * jnp.dtype(w.dtype).itemsize
                                 + b.size * jnp.dtype(b.dtype).itemsize)
        total += 4 * bm * w.shape[1]         # f32 intermediate per layer
    return total


def actor_forward(params, state, *, block_batch=4096, num_cores=1,
                  single_buffer_params=True):
    """Actor.forward with a single fused Pallas kernel.

    params: list of (W, b) with W as (in_features, out_features), b as (1, out) f32.
    state:  (batch, state_dims), f32 or bf16.
    block_batch: rows per grid step (tunable; 2048-8192 recommended for large M).
    num_cores: set to 2 on v7x to shard the batch grid across both TensorCores
               via CORE_PARALLEL; leave 1 on v5e/v6e.
    single_buffer_params: single-buffer the constant-index weight/bias operands.
    """
    m, k_in = state.shape
    n_layers = len(params)
    assert n_layers >= 1
    action_dims = params[-1][0].shape[1]

    bm = _pick_batch_tile(m, block_batch, num_cores)
    grid = (pl.cdiv(m, bm),)

    param_mode = pl.Buffered(1) if single_buffer_params else None

    in_specs = [pl.BlockSpec((bm, k_in), lambda i: (i, 0))]
    flat_args = [state]
    for w, b in params:
        ki, ko = w.shape
        assert b.shape == (1, ko), (b.shape, ko)
        in_specs.append(
            pl.BlockSpec((ki, ko), lambda i: (0, 0), pipeline_mode=param_mode))
        in_specs.append(
            pl.BlockSpec((1, ko), lambda i: (0, 0), pipeline_mode=param_mode))
        flat_args.append(w)
        flat_args.append(b)

    out_specs = pl.BlockSpec((bm, action_dims), lambda i: (i, 0))

    # Explicit scoped-VMEM limit only when the working set could exceed the
    # conservative 16 MiB (v5e) default; capped well under v7x's 64 MiB.
    vmem_limit = None
    est = _estimate_vmem_bytes(bm, k_in, action_dims, params, state.dtype,
                               single_buffer_params)
    if est > 10 * 1024 * 1024:
        vmem_limit = min(int(est * 1.5), 56 * 1024 * 1024)

    batch_sem = pltpu.CORE_PARALLEL if (num_cores > 1 and grid[0] > 1) \
        else pltpu.PARALLEL

    kernel = functools.partial(_fused_mlp_kernel, n_layers=n_layers)
    return pl.pallas_call(
        kernel,
        out_shape=jax.ShapeDtypeStruct((m, action_dims), state.dtype),
        grid=grid,
        in_specs=in_specs,
        out_specs=out_specs,
        compiler_params=pltpu.CompilerParams(
            dimension_semantics=(batch_sem,),
            vmem_limit_bytes=vmem_limit),
    )(*flat_args)


def init_actor_params(key, state_dims, net_arch, action_dims,
                      weight_dtype=jnp.float32):
    """Deterministic init matching the layer shapes of the PyTorch Actor.

    Weights are stored as (in_features, out_features) (transpose of PyTorch's
    nn.Linear layout) and biases as (1, out_features) f32, so the forward pass
    feeds the kernel directly with no per-call reshape/transpose.
    """
    dims = [state_dims] + list(net_arch) + [action_dims]
    params = []
    for i in range(len(dims) - 1):
        fan_in, fan_out = dims[i], dims[i + 1]
        key, wk, bk = jax.random.split(key, 3)
        bound = 1.0 / (float(fan_in) ** 0.5)  # PyTorch default Linear init range
        w = jax.random.uniform(wk, (fan_in, fan_out), jnp.float32, -bound, bound)
        b = jax.random.uniform(bk, (1, fan_out), jnp.float32, -bound, bound)
        params.append((w.astype(weight_dtype), b))
    return params


def _reference(params, state):
    h = state.astype(jnp.float32)
    for i, (w, b) in enumerate(params):
        h = h @ w.astype(jnp.float32) + b
        h = jnp.maximum(h, 0.0) if i < len(params) - 1 else jnp.tanh(h)
    return h


def _run(params, state, **kw):
    """Jit + run; falls back to double-buffered params if Buffered(1) is
    unsupported by the local JAX/Mosaic build."""
    try:
        fn = jax.jit(functools.partial(actor_forward, **kw))
        return jax.block_until_ready(fn(params, state))
    except Exception:
        kw = dict(kw, single_buffer_params=False)
        fn = jax.jit(functools.partial(actor_forward, **kw))
        return jax.block_until_ready(fn(params, state))


if __name__ == "__main__":
    # Shapes consistent with the module: state_dims=16, net_arch=[32, 32],
    # action_dims=4, batch=8.
    state_dims, net_arch, action_dims, batch = 16, [32, 32], 4, 8

    key = jax.random.PRNGKey(0)
    key, pkey, skey = jax.random.split(key, 3)

    params = init_actor_params(pkey, state_dims, net_arch, action_dims)
    state = jax.random.normal(skey, (batch, state_dims), jnp.float32)

    # 1) Small demo batch — single VMEM-resident block, grid=(1,).
    out = _run(params, state)
    ref = _reference(params, state)
    assert out.shape == (batch, action_dims)
    assert jnp.allclose(out, ref, atol=1e-5, rtol=1e-5)

    # 2) Tiled path — multi-block grid with a partial last block.
    key, skey2 = jax.random.split(key)
    big_state = jax.random.normal(skey2, (400, state_dims), jnp.float32)
    out_big = _run(params, big_state, block_batch=128)
    assert jnp.allclose(out_big, _reference(params, big_state),
                        atol=1e-5, rtol=1e-5)

    # 3) bf16 HBM-read path (bf16 state + weights, f32 accumulate/intermediates).
    params_bf16 = [(w.astype(jnp.bfloat16), b) for w, b in params]
    out_bf16 = _run(params_bf16, state.astype(jnp.bfloat16))
    assert jnp.allclose(out_bf16.astype(jnp.float32), ref, atol=5e-2, rtol=5e-2)

    print("KERNEL_OK")
</pallas_src>

<mosaic_0001>
module attributes {stable_mosaic.version = 11 : i64} {
  func.func @_fused_mlp_kernel(%arg0: i32, %arg1: memref<8x16xf32, #tpu.memory_space<vmem>>, %arg2: memref<16x32xf32, #tpu.memory_space<vmem>>, %arg3: memref<1x32xf32, #tpu.memory_space<vmem>>, %arg4: memref<32x32xf32, #tpu.memory_space<vmem>>, %arg5: memref<1x32xf32, #tpu.memory_space<vmem>>, %arg6: memref<32x4xf32, #tpu.memory_space<vmem>>, %arg7: memref<1x4xf32, #tpu.memory_space<vmem>>, %arg8: memref<8x4xf32, #tpu.memory_space<vmem>>) attributes {dimension_semantics = [#tpu.dimension_semantics<parallel>], iteration_bounds = array<i64: 1>, scalar_prefetch = 0 : i64, scratch_operands = 0 : i64, tpu.core_type = #tpu.core_type<tc>, window_params = [{transform_indices = @transform_0, window_bounds = array<i64: 8, 16>}, {pipeline_mode = #tpu.pipeline_mode<synchronous>, transform_indices = @transform_1, window_bounds = array<i64: 16, 32>}, {pipeline_mode = #tpu.pipeline_mode<synchronous>, transform_indices = @transform_2, window_bounds = array<i64: 1, 32>}, {pipeline_mode = #tpu.pipeline_mode<synchronous>, transform_indices = @transform_3, window_bounds = array<i64: 32, 32>}, {pipeline_mode = #tpu.pipeline_mode<synchronous>, transform_indices = @transform_4, window_bounds = array<i64: 1, 32>}, {pipeline_mode = #tpu.pipeline_mode<synchronous>, transform_indices = @transform_5, window_bounds = array<i64: 32, 4>}, {pipeline_mode = #tpu.pipeline_mode<synchronous>, transform_indices = @transform_6, window_bounds = array<i64: 1, 4>}, {transform_indices = @transform_7, window_bounds = array<i64: 8, 4>}]} {
    %c0 = arith.constant 0 : index
    %c0_0 = arith.constant 0 : index
    %0 = vector.load %arg1[%c0, %c0_0] : memref<8x16xf32, #tpu.memory_space<vmem>>, vector<8x16xf32>
    %c0_1 = arith.constant 0 : index
    %c0_2 = arith.constant 0 : index
    %1 = vector.load %arg2[%c0_1, %c0_2] : memref<16x32xf32, #tpu.memory_space<vmem>>, vector<16x32xf32>
    %cst = arith.constant dense<0.000000e+00> : vector<8x32xf32>
    %2 = tpu.matmul %0, %1, %cst {dimension_numbers = #tpu.dot_dimension_numbers<[1], [0], [0], [1], [0, 0, 1, 1], [], []>} : vector<8x16xf32>, vector<16x32xf32>, vector<8x32xf32> -> vector<8x32xf32>
    %c0_3 = arith.constant 0 : index
    %c0_4 = arith.constant 0 : index
    %3 = vector.load %arg3[%c0_3, %c0_4] : memref<1x32xf32, #tpu.memory_space<vmem>>, vector<1x32xf32>
    %4 = vector.broadcast %3 : vector<1x32xf32> to vector<8x32xf32>
    %5 = arith.addf %2, %4 : vector<8x32xf32>
    %cst_5 = arith.constant 0.000000e+00 : f32
    %6 = vector.broadcast %cst_5 : f32 to vector<8x32xf32>
    %7 = arith.maximumf %5, %6 : vector<8x32xf32>
    %c0_6 = arith.constant 0 : index
    %c0_7 = arith.constant 0 : index
    %8 = vector.load %arg4[%c0_6, %c0_7] : memref<32x32xf32, #tpu.memory_space<vmem>>, vector<32x32xf32>
    %cst_8 = arith.constant dense<0.000000e+00> : vector<8x32xf32>
    %9 = tpu.matmul %7, %8, %cst_8 {dimension_numbers = #tpu.dot_dimension_numbers<[1], [0], [0], [1], [0, 0, 1, 1], [], []>} : vector<8x32xf32>, vector<32x32xf32>, vector<8x32xf32> -> vector<8x32xf32>
    %c0_9 = arith.constant 0 : index
    %c0_10 = arith.constant 0 : index
    %10 = vector.load %arg5[%c0_9, %c0_10] : memref<1x32xf32, #tpu.memory_space<vmem>>, vector<1x32xf32>
    %11 = vector.broadcast %10 : vector<1x32xf32> to vector<8x32xf32>
    %12 = arith.addf %9, %11 : vector<8x32xf32>
    %cst_11 = arith.constant 0.000000e+00 : f32
    %13 = vector.broadcast %cst_11 : f32 to vector<8x32xf32>
    %14 = arith.maximumf %12, %13 : vector<8x32xf32>
    %c0_12 = arith.constant 0 : index
    %c0_13 = arith.constant 0 : index
    %15 = vector.load %arg6[%c0_12, %c0_13] : memref<32x4xf32, #tpu.memory_space<vmem>>, vector<32x4xf32>
    %cst_14 = arith.constant dense<0.000000e+00> : vector<8x4xf32>
    %16 = tpu.matmul %14, %15, %cst_14 {dimension_numbers = #tpu.dot_dimension_numbers<[1], [0], [0], [1], [0, 0, 1, 1], [], []>} : vector<8x32xf32>, vector<32x4xf32>, vector<8x4xf32> -> vector<8x4xf32>
    %c0_15 = arith.constant 0 : index
    %c0_16 = arith.constant 0 : index
    %17 = vector.load %arg7[%c0_15, %c0_16] : memref<1x4xf32, #tpu.memory_space<vmem>>, vector<1x4xf32>
    %18 = vector.broadcast %17 : vector<1x4xf32> to vector<8x4xf32>
    %19 = arith.addf %16, %18 : vector<8x4xf32>
    %20 = math.tanh %19 : vector<8x4xf32>
    %c0_17 = arith.constant 0 : index
    %c0_18 = arith.constant 0 : index
    %21 = vector.load %arg8[%c0_17, %c0_18] : memref<8x4xf32, #tpu.memory_space<vmem>>, vector<8x4xf32>
    tpu.vector_store %arg8[%c0_17, %c0_18], %20 {strides = array<i32>} : memref<8x4xf32, #tpu.memory_space<vmem>>, vector<8x4xf32>,
    return
  }
  func.func @transform_0(%arg0: i32) -> (i32, i32) {
    %c0_i32 = arith.constant 0 : i32
    %c0_i32_0 = arith.constant 0 : i32
    return %arg0, %c0_i32 : i32, i32
  }
  func.func @transform_1(%arg0: i32) -> (i32, i32) {
    %c0_i32 = arith.constant 0 : i32
    %c0_i32_0 = arith.constant 0 : i32
    %c0_i32_1 = arith.constant 0 : i32
    return %c0_i32, %c0_i32_0 : i32, i32
  }
  func.func @transform_2(%arg0: i32) -> (i32, i32) {
    %c0_i32 = arith.constant 0 : i32
    %c0_i32_0 = arith.constant 0 : i32
    %c0_i32_1 = arith.constant 0 : i32
    return %c0_i32, %c0_i32_0 : i32, i32
  }
  func.func @transform_3(%arg0: i32) -> (i32, i32) {
    %c0_i32 = arith.constant 0 : i32
    %c0_i32_0 = arith.constant 0 : i32
    %c0_i32_1 = arith.constant 0 : i32
    return %c0_i32, %c0_i32_0 : i32, i32
  }
  func.func @transform_4(%arg0: i32) -> (i32, i32) {
    %c0_i32 = arith.constant 0 : i32
    %c0_i32_0 = arith.constant 0 : i32
    %c0_i32_1 = arith.constant 0 : i32
    return %c0_i32, %c0_i32_0 : i32, i32
  }
  func.func @transform_5(%arg0: i32) -> (i32, i32) {
    %c0_i32 = arith.constant 0 : i32
    %c0_i32_0 = arith.constant 0 : i32
    %c0_i32_1 = arith.constant 0 : i32
    return %c0_i32, %c0_i32_0 : i32, i32
  }
  func.func @transform_6(%arg0: i32) -> (i32, i32) {
    %c0_i32 = arith.constant 0 : i32
    %c0_i32_0 = arith.constant 0 : i32
    %c0_i32_1 = arith.constant 0 : i32
    return %c0_i32, %c0_i32_0 : i32, i32
  }
  func.func @transform_7(%arg0: i32) -> (i32, i32) {
    %c0_i32 = arith.constant 0 : i32
    %c0_i32_0 = arith.constant 0 : i32
    return %arg0, %c0_i32 : i32, i32
  }
}

module attributes {stable_mosaic.version = 11 : i64} {
  func.func @_fused_mlp_kernel(%arg0: i32, %arg1: memref<8x16xf32, #tpu.memory_space<vmem>>, %arg2: memref<16x32xf32, #tpu.memory_space<vmem>>, %arg3: memref<1x32xf32, #tpu.memory_space<vmem>>, %arg4: memref<32x32xf32, #tpu.memory_space<vmem>>, %arg5: memref<1x32xf32, #tpu.memory_space<vmem>>, %arg6: memref<32x4xf32, #tpu.memory_space<vmem>>, %arg7: memref<1x4xf32, #tpu.memory_space<vmem>>, %arg8: memref<8x4xf32, #tpu.memory_space<vmem>>) attributes {dimension_semantics = [#tpu.dimension_semantics<parallel>], iteration_bounds = array<i64: 1>, scalar_prefetch = 0 : i64, scratch_operands = 0 : i64, tpu.core_type = #tpu.core_type<tc>, window_params = [{transform_indices = @transform_0, window_bounds = array<i64: 8, 16>}, {pipeline_mode = #tpu.pipeline_mode<synchronous>, transform_indices = @transform_1, window_bounds = array<i64: 16, 32>}, {pipeline_mode = #tpu.pipeline_mode<synchronous>, transform_indices = @transform_2, window_bounds = array<i64: 1, 32>}, {pipeline_mode = #tpu.pipeline_mode<synchronous>, transform_indices = @transform_3, window_bounds = array<i64: 32, 32>}, {pipeline_mode = #tpu.pipeline_mode<synchronous>, transform_indices = @transform_4, window_bounds = array<i64: 1, 32>}, {pipeline_mode = #tpu.pipeline_mode<synchronous>, transform_indices = @transform_5, window_bounds = array<i64: 32, 4>}, {pipeline_mode = #tpu.pipeline_mode<synchronous>, transform_indices = @transform_6, window_bounds = array<i64: 1, 4>}, {transform_indices = @transform_7, window_bounds = array<i64: 8, 4>}]} {
    %c0 = arith.constant 0 : index
    %c0_0 = arith.constant 0 : index
    %0 = vector.load %arg1[%c0, %c0_0] : memref<8x16xf32, #tpu.memory_space<vmem>>, vector<8x16xf32>
    %c0_1 = arith.constant 0 : index
    %c0_2 = arith.constant 0 : index
    %1 = vector.load %arg2[%c0_1, %c0_2] : memref<16x32xf32, #tpu.memory_space<vmem>>, vector<16x32xf32>
    %cst = arith.constant dense<0.000000e+00> : vector<8x32xf32>
    %2 = tpu.matmul %0, %1, %cst {dimension_numbers = #tpu.dot_dimension_numbers<[1], [0], [0], [1], [0, 0, 1, 1], [], []>} : vector<8x16xf32>, vector<16x32xf32>, vector<8x32xf32> -> vector<8x32xf32>
    %c0_3 = arith.constant 0 : index
    %c0_4 = arith.constant 0 : index
    %3 = vector.load %arg3[%c0_3, %c0_4] : memref<1x32xf32, #tpu.memory_space<vmem>>, vector<1x32xf32>
    %4 = vector.broadcast %3 : vector<1x32xf32> to vector<8x32xf32>
    %5 = arith.addf %2, %4 : vector<8x32xf32>
    %cst_5 = arith.constant 0.000000e+00 : f32
    %6 = vector.broadcast %cst_5 : f32 to vector<8x32xf32>
    %7 = arith.maximumf %5, %6 : vector<8x32xf32>
    %c0_6 = arith.constant 0 : index
    %c0_7 = arith.constant 0 : index
    %8 = vector.load %arg4[%c0_6, %c0_7] : memref<32x32xf32, #tpu.memory_space<vmem>>, vector<32x32xf32>
    %cst_8 = arith.constant dense<0.000000e+00> : vector<8x32xf32>
    %9 = tpu.matmul %7, %8, %cst_8 {dimension_numbers = #tpu.dot_dimension_numbers<[1], [0], [0], [1], [0, 0, 1, 1], [], []>} : vector<8x32xf32>, vector<32x32xf32>, vector<8x32xf32> -> vector<8x32xf32>
    %c0_9 = arith.constant 0 : index
    %c0_10 = arith.constant 0 : index
    %10 = vector.load %arg5[%c0_9, %c0_10] : memref<1x32xf32, #tpu.memory_space<vmem>>, vector<1x32xf32>
    %11 = vector.broadcast %10 : vector<1x32xf32> to vector<8x32xf32>
    %12 = arith.addf %9, %11 : vector<8x32xf32>
    %cst_11 = arith.constant 0.000000e+00 : f32
    %13 = vector.broadcast %cst_11 : f32 to vector<8x32xf32>
    %14 = arith.maximumf %12, %13 : vector<8x32xf32>
    %c0_12 = arith.constant 0 : index
    %c0_13 = arith.constant 0 : index
    %15 = vector.load %arg6[%c0_12, %c0_13] : memref<32x4xf32, #tpu.memory_space<vmem>>, vector<32x4xf32>
    %cst_14 = arith.constant dense<0.000000e+00> : vector<8x4xf32>
    %16 = tpu.matmul %14, %15, %cst_14 {dimension_numbers = #tpu.dot_dimension_numbers<[1], [0], [0], [1], [0, 0, 1, 1], [], []>} : vector<8x32xf32>, vector<32x4xf32>, vector<8x4xf32> -> vector<8x4xf32>
    %c0_15 = arith.constant 0 : index
    %c0_16 = arith.constant 0 : index
    %17 = vector.load %arg7[%c0_15, %c0_16] : memref<1x4xf32, #tpu.memory_space<vmem>>, vector<1x4xf32>
    %18 = vector.broadcast %17 : vector<1x4xf32> to vector<8x4xf32>
    %19 = arith.addf %16, %18 : vector<8x4xf32>
    %20 = math.tanh %19 : vector<8x4xf32>
    %c0_17 = arith.constant 0 : index
    %c0_18 = arith.constant 0 : index
    %21 = vector.load %arg8[%c0_17, %c0_18] : memref<8x4xf32, #tpu.memory_space<vmem>>, vector<8x4xf32>
    tpu.vector_store %arg8[%c0_17, %c0_18], %20 {strides = array<i32>} : memref<8x4xf32, #tpu.memory_space<vmem>>, vector<8x4xf32>,
    return
  }
  func.func @transform_0(%arg0: i32) -> (i32, i32) {
    %c0_i32 = arith.constant 0 : i32
    %c0_i32_0 = arith.constant 0 : i32
    return %arg0, %c0_i32 : i32, i32
  }
  func.func @transform_1(%arg0: i32) -> (i32, i32) {
    %c0_i32 = arith.constant 0 : i32
    %c0_i32_0 = arith.constant 0 : i32
    %c0_i32_1 = arith.constant 0 : i32
    return %c0_i32, %c0_i32_0 : i32, i32
  }
  func.func @transform_2(%arg0: i32) -> (i32, i32) {
    %c0_i32 = arith.constant 0 : i32
    %c0_i32_0 = arith.constant 0 : i32
    %c0_i32_1 = arith.constant 0 : i32
    return %c0_i32, %c0_i32_0 : i32, i32
  }
  func.func @transform_3(%arg0: i32) -> (i32, i32) {
    %c0_i32 = arith.constant 0 : i32
    %c0_i32_0 = arith.constant 0 : i32
    %c0_i32_1 = arith.constant 0 : i32
    return %c0_i32, %c0_i32_0 : i32, i32
  }
  func.func @transform_4(%arg0: i32) -> (i32, i32) {
    %c0_i32 = arith.constant 0 : i32
    %c0_i32_0 = arith.constant 0 : i32
    %c0_i32_1 = arith.constant 0 : i32
    return %c0_i32, %c0_i32_0 : i32, i32
  }
  func.func @transform_5(%arg0: i32) -> (i32, i32) {
    %c0_i32 = arith.constant 0 : i32
    %c0_i32_0 = arith.constant 0 : i32
    %c0_i32_1 = arith.constant 0 : i32
    return %c0_i32, %c0_i32_0 : i32, i32
  }
  func.func @transform_6(%arg0: i32) -> (i32, i32) {
    %c0_i32 = arith.constant 0 : i32
    %c0_i32_0 = arith.constant 0 : i32
    %c0_i32_1 = arith.constant 0 : i32
    return %c0_i32, %c0_i32_0 : i32, i32
  }
  func.func @transform_7(%arg0: i32) -> (i32, i32) {
    %c0_i32 = arith.constant 0 : i32
    %c0_i32_0 = arith.constant 0 : i32
    return %arg0, %c0_i32 : i32, i32
  }
}

</mosaic_0001>

<bundles_post_ra>
// kernel: actor_forward.1
= control target key start
LH: loop header
LB: loop body
LE: loop exit
PB: predicated region body
PF: predicated region fallthrough
CT: control target
= control target key end

     0   :  { %12 = vsyncpa [#allocation3], 0  ;;  %s393_s0 = inlined_call_operand.vmem [shape: f32[8,16], index: 0, kind: input, shape index: {}]   ;;  %s394_s1 = inlined_call_operand.hbm [shape: f32[16,32], index: 1, kind: input, shape index: {}]   ;;  %s395_s2 = inlined_call_operand.hbm [shape: f32[1,32], index: 2, kind: input, shape index: {}]   ;;  %s396_s3 = inlined_call_operand.vmem [shape: f32[32,32], index: 3, kind: input, shape index: {}]   ;;  %s397_s4 = inlined_call_operand.hbm [shape: f32[1,32], index: 4, kind: input, shape index: {}]   ;;  %s398_s5 = inlined_call_operand.vmem [shape: f32[32,4], index: 5, kind: input, shape index: {}]   ;;  %s399_s6 = inlined_call_operand.hbm [shape: f32[1,4], index: 6, kind: input, shape index: {}]   ;;  %s400_s7 = inlined_call_operand.vmem [shape: f32[8,4], index: 7, kind: output, shape index: {}]  }
   0x1   :  { %13 = vsyncpa [#allocation5], 0  ;;  %s35_s26 = sshll.u32 %s395_s2, 4  ;;  %s36_s26 = int_to_ptr.hbm [resolvable:$true] %s35_s26 }
   0x2   :  { %14 = vsyncpa [#allocation8], 0  ;;  %s305_s27 = smov [#allocation4]   ;;  %s21_s8 = sshll.u32 %s394_s1, 4  ;;  %s22_s8 = int_to_ptr.hbm [resolvable:$true] %s21_s8 }
   0x3   :  { %s37_s28 = sshll.u32 %s305_s27, 4  ;;  %s306_s9 = smov [#allocation2]   ;;  %s38_s28 = int_to_ptr.vmem [resolvable:$true] %s37_s28 }
   0x4   :  { %40 = dma.hbm_to_vmem [thread:$0]  %s36_s26, 16, %s38_s28, [#allocation5]  }
   0x5   :  { %s23_s10 = sshll.u32 %s306_s9, 4  ;;  %s307_s11 = smov 128   ;;  %s24_s10 = int_to_ptr.vmem [resolvable:$true] %s23_s10 }
   0x6   :  { %s308_s12 = smov 8   ;;  %s48_s2 = sshll.u32 %s397_s4, 4  ;;  %s49_s2 = int_to_ptr.hbm [resolvable:$true] %s48_s2 }
   0x7   :  { %29 = dma.hbm_to_vmem [thread:$0]  %s22_s8, 256, %s24_s10, [#allocation3], %s307_s11, %s307_s11, %s308_s12  }
   0x8   :  { %s309_s15 = smov [#allocation6]   ;;  %s61_s1 = sshll.u32 %s399_s6, 4  ;;  %s62_s1 = int_to_ptr.hbm [resolvable:$true] %s61_s1 }
   0x9   :  { %s50_s16 = sshll.u32 %s309_s15, 4  ;;  %s310_s19 = smov [#allocation7]   ;;  %s51_s16 = int_to_ptr.vmem [resolvable:$true] %s50_s16 }
   0xa   :  { %53 = dma.hbm_to_vmem [thread:$0]  %s49_s2, 16, %s51_s16, [#allocation5]  }
   0xb   :  { %s63_s20 = sshll.u32 %s310_s19, 4  ;;  %s64_s20 = int_to_ptr.vmem [resolvable:$true] %s63_s20 }
   0xc   :  { %66 = dma.hbm_to_vmem [thread:$0]  %s62_s1, 16, %s64_s20, [#allocation8]  }
   0xd   :  { %299 = dma.done.wait [#allocation3], 256  }
   0xe   :  { %300 = vsyncadd [#allocation3], 4294967040 }
   0xf   :  { %301 = dma.done.wait [#allocation5], 32  }
  0x10   :  { %302 = vsyncadd [#allocation5], 4294967264 }
  0x11   :  { %303 = dma.done.wait [#allocation8], 16  }
  0x12   :  { %304 = vsyncadd [#allocation8], 4294967280  ;;  %v85_v0 = vld [vmem:[#allocation2 + $0x8] sm:$0xff]  ;;  %v84_v1 = vld [vmem:[#allocation2] sm:$0xff]  ;;  %vm90_vm0 = vcmask 130048   ;;  %vm123_vm1 = vcmask 261120  }
  0x13   :  { %108 = vmatpush.msra.mxu0 %v85_v0  ;;  %v83_v2 = vld [vmem:[%s393_s0] sm:$0xff]  ;;  %v118_v3 = vld [vmem:[%s396_s3 + $0x18] sm:$0xff]  ;;  %v117_v4 = vld [vmem:[%s396_s3 + $0x10] sm:$0xff]  ;;  %vm180_vm2 = vcmask 31744  }
  0x14   :  { %139 = vmatpush.msra.mxu1 %v118_v3  ;;  %v116_v5 = vld [vmem:[%s396_s3 + $0x8] sm:$0xff]  ;;  %v115_v6 = vld [vmem:[%s396_s3] sm:$0xff]  ;;  %v151_v7 = vld [vmem:[%s398_s5 + $0x18] sm:$0xff] }
  0x15   :  { %109 = vmatpush.msra.mxu0 %v84_v1  ;;  %171 = vmatpush.msra.mxu2 %v151_v7  ;;  %v198_v8 = vld [vmem:[#allocation4] ss:$0 sm:$0xff]  ;;  %v149_v13 = vld [vmem:[%s398_s5 + $0x8] sm:$0xff]  ;;  %v148_v14 = vld [vmem:[%s398_s5] sm:$0xff] }
  0x16   :  { %189 = vmatmul.msk.f32.vlgmr.msra.gmra.mxu0 %vm90_vm0, %v83_v2  ;;  %140 = vmatpush.msra.mxu1 %v117_v4  ;;  %v150_v12 = vld [vmem:[%s398_s5 + $0x10] sm:$0xff] }
  0x17   :  { %172 = vmatpush.msra.mxu2 %v150_v12  ;;  %v199_v15 = vld [vmem:[#allocation6] ss:$0 sm:$0xff]  ;;  %v200_v19 = vld [vmem:[#allocation7] ss:$0 sm:$0xff] }
  0x18   :  { %141 = vmatpush.msra.mxu1 %v116_v5 }
  0x19   :  { %173 = vmatpush.msra.mxu2 %v149_v13 }
  0x1a   :  { %142 = vmatpush.msra.mxu1 %v115_v6 }
  0x1b   :  { %174 = vmatpush.msra.mxu2 %v148_v14 }
  0x93   :  { %v111_v9 = vpop.f32.mrf.mxu0 }
  0x94   :  { %v112_v10 = vadd.f32 %v198_v8, %v111_v9 }
  0x96   :  { %v114_v11 = vmax.f32 %v112_v10, 0.0 }
  0x98   :  { %190 = vmatmul.msk.f32.vlgmr.msra.gmra.mxu1 %vm123_vm1, %v114_v11 }
 0x115   :  { %v144_v16 = vpop.f32.mrf.mxu1 }
 0x116   :  { %v145_v17 = vadd.f32 %v199_v15, %v144_v16 }
 0x118   :  { %v147_v18 = vmax.f32 %v145_v17, 0.0 }
 0x11a   :  { %191 = vmatmul.msk.f32.vlgmr.msra.gmra.mxu2 %vm123_vm1, %v147_v18 }
 0x19d   :  { %v176_v20 = vpop.f32.mrf.mxu2 }
 0x19e   :  { %v177_v21 = vadd.f32 %v200_v19, %v176_v20 }
 0x1a0   :  { %201 = vtanh.f32 %v177_v21 }
 0x1a6   :  { %v202_v22 = vpop.eup %201 }
 0x1a7   :  { %181 = vst.msk [vmem:[%s400_s7] sm:$0xff] %vm180_vm2, %v202_v22 }
 0x1a8   :  { %186 = vsyncpa [#allocation3], 1 }
 0x1a9   :  { %187 = vsyncpa [#allocation5], 1 }
 0x1aa   :  { %188 = vsyncpa [#allocation8], 1 }

// kernel: actor_forward.1
= control target key start
LH: loop header
LB: loop body
LE: loop exit
PB: predicated region body
PF: predicated region fallthrough
CT: control target
= control target key end

     0   :  { %12 = vsyncpa [#allocation3], 0  ;;  %s393_s0 = inlined_call_operand.vmem [shape: f32[8,16], index: 0, kind: input, shape index: {}]   ;;  %s394_s1 = inlined_call_operand.hbm [shape: f32[16,32], index: 1, kind: input, shape index: {}]   ;;  %s395_s2 = inlined_call_operand.hbm [shape: f32[1,32], index: 2, kind: input, shape index: {}]   ;;  %s396_s3 = inlined_call_operand.vmem [shape: f32[32,32], index: 3, kind: input, shape index: {}]   ;;  %s397_s4 = inlined_call_operand.hbm [shape: f32[1,32], index: 4, kind: input, shape index: {}]   ;;  %s398_s5 = inlined_call_operand.vmem [shape: f32[32,4], index: 5, kind: input, shape index: {}]   ;;  %s399_s6 = inlined_call_operand.hbm [shape: f32[1,4], index: 6, kind: input, shape index: {}]   ;;  %s400_s7 = inlined_call_operand.vmem [shape: f32[8,4], index: 7, kind: output, shape index: {}]  }
   0x1   :  { %13 = vsyncpa [#allocation5], 0  ;;  %s35_s26 = sshll.u32 %s395_s2, 4  ;;  %s36_s26 = int_to_ptr.hbm [resolvable:$true] %s35_s26 }
   0x2   :  { %14 = vsyncpa [#allocation8], 0  ;;  %s305_s27 = smov [#allocation4]   ;;  %s21_s8 = sshll.u32 %s394_s1, 4  ;;  %s22_s8 = int_to_ptr.hbm [resolvable:$true] %s21_s8 }
   0x3   :  { %s37_s28 = sshll.u32 %s305_s27, 4  ;;  %s306_s9 = smov [#allocation2]   ;;  %s38_s28 = int_to_ptr.vmem [resolvable:$true] %s37_s28 }
   0x4   :  { %40 = dma.hbm_to_vmem [thread:$0]  %s36_s26, 16, %s38_s28, [#allocation5]  }
   0x5   :  { %s23_s10 = sshll.u32 %s306_s9, 4  ;;  %s307_s11 = smov 128   ;;  %s24_s10 = int_to_ptr.vmem [resolvable:$true] %s23_s10 }
   0x6   :  { %s308_s12 = smov 8   ;;  %s48_s2 = sshll.u32 %s397_s4, 4  ;;  %s49_s2 = int_to_ptr.hbm [resolvable:$true] %s48_s2 }
   0x7   :  { %29 = dma.hbm_to_vmem [thread:$0]  %s22_s8, 256, %s24_s10, [#allocation3], %s307_s11, %s307_s11, %s308_s12  }
   0x8   :  { %s309_s15 = smov [#allocation6]   ;;  %s61_s1 = sshll.u32 %s399_s6, 4  ;;  %s62_s1 = int_to_ptr.hbm [resolvable:$true] %s61_s1 }
   0x9   :  { %s50_s16 = sshll.u32 %s309_s15, 4  ;;  %s310_s19 = smov [#allocation7]   ;;  %s51_s16 = int_to_ptr.vmem [resolvable:$true] %s50_s16 }
   0xa   :  { %53 = dma.hbm_to_vmem [thread:$0]  %s49_s2, 16, %s51_s16, [#allocation5]  }
   0xb   :  { %s63_s20 = sshll.u32 %s310_s19, 4  ;;  %s64_s20 = int_to_ptr.vmem [resolvable:$true] %s63_s20 }
   0xc   :  { %66 = dma.hbm_to_vmem [thread:$0]  %s62_s1, 16, %s64_s20, [#allocation8]  }
   0xd   :  { %299 = dma.done.wait [#allocation3], 256  }
   0xe   :  { %300 = vsyncadd [#allocation3], 4294967040 }
   0xf   :  { %301 = dma.done.wait [#allocation5], 32  }
  0x10   :  { %302 = vsyncadd [#allocation5], 4294967264 }
  0x11   :  { %303 = dma.done.wait [#allocation8], 16  }
  0x12   :  { %304 = vsyncadd [#allocation8], 4294967280  ;;  %v85_v0 = vld [vmem:[#allocation2 + $0x8] sm:$0xff]  ;;  %v84_v1 = vld [vmem:[#allocation2] sm:$0xff]  ;;  %vm90_vm0 = vcmask 130048   ;;  %vm123_vm1 = vcmask 261120  }
  0x13   :  { %108 = vmatpush.msra.mxu0 %v85_v0  ;;  %v83_v2 = vld [vmem:[%s393_s0] sm:$0xff]  ;;  %v118_v3 = vld [vmem:[%s396_s3 + $0x18] sm:$0xff]  ;;  %v117_v4 = vld [vmem:[%s396_s3 + $0x10] sm:$0xff]  ;;  %vm180_vm2 = vcmask 31744  }
  0x14   :  { %139 = vmatpush.msra.mxu1 %v118_v3  ;;  %v116_v5 = vld [vmem:[%s396_s3 + $0x8] sm:$0xff]  ;;  %v115_v6 = vld [vmem:[%s396_s3] sm:$0xff]  ;;  %v151_v7 = vld [vmem:[%s398_s5 + $0x18] sm:$0xff] }
  0x15   :  { %109 = vmatpush.msra.mxu0 %v84_v1  ;;  %171 = vmatpush.msra.mxu2 %v151_v7  ;;  %v198_v8 = vld [vmem:[#allocation4] ss:$0 sm:$0xff]  ;;  %v149_v13 = vld [vmem:[%s398_s5 + $0x8] sm:$0xff]  ;;  %v148_v14 = vld [vmem:[%s398_s5] sm:$0xff] }
  0x16   :  { %189 = vmatmul.msk.f32.vlgmr.msra.gmra.mxu0 %vm90_vm0, %v83_v2  ;;  %140 = vmatpush.msra.mxu1 %v117_v4  ;;  %v150_v12 = vld [vmem:[%s398_s5 + $0x10] sm:$0xff] }
  0x17   :  { %172 = vmatpush.msra.mxu2 %v150_v12  ;;  %v199_v15 = vld [vmem:[#allocation6] ss:$0 sm:$0xff]  ;;  %v200_v19 = vld [vmem:[#allocation7] ss:$0 sm:$0xff] }
  0x18   :  { %141 = vmatpush.msra.mxu1 %v116_v5 }
  0x19   :  { %173 = vmatpush.msra.mxu2 %v149_v13 }
  0x1a   :  { %142 = vmatpush.msra.mxu1 %v115_v6 }
  0x1b   :  { %174 = vmatpush.msra.mxu2 %v148_v14 }
  0x93   :  { %v111_v9 = vpop.f32.mrf.mxu0 }
  0x94   :  { %v112_v10 = vadd.f32 %v198_v8, %v111_v9 }
  0x96   :  { %v114_v11 = vmax.f32 %v112_v10, 0.0 }
  0x98   :  { %190 = vmatmul.msk.f32.vlgmr.msra.gmra.mxu1 %vm123_vm1, %v114_v11 }
 0x115   :  { %v144_v16 = vpop.f32.mrf.mxu1 }
 0x116   :  { %v145_v17 = vadd.f32 %v199_v15, %v144_v16 }
 0x118   :  { %v147_v18 = vmax.f32 %v145_v17, 0.0 }
 0x11a   :  { %191 = vmatmul.msk.f32.vlgmr.msra.gmra.mxu2 %vm123_vm1, %v147_v18 }
 0x19d   :  { %v176_v20 = vpop.f32.mrf.mxu2 }
 0x19e   :  { %v177_v21 = vadd.f32 %v200_v19, %v176_v20 }
 0x1a0   :  { %201 = vtanh.f32 %v177_v21 }
 0x1a6   :  { %v202_v22 = vpop.eup %201 }
 0x1a7   :  { %181 = vst.msk [vmem:[%s400_s7] sm:$0xff] %vm180_vm2, %v202_v22 }
 0x1a8   :  { %186 = vsyncpa [#allocation3], 1 }
 0x1a9   :  { %187 = vsyncpa [#allocation5], 1 }
 0x1aa   :  { %188 = vsyncpa [#allocation8], 1 }

</bundles_post_ra>
